<compile_context>
chip_gen: v7x
topology: tpu7x:2x2x1
jax: 0.10.0
libtpu: 0.0.40
codegen_flags: <defaults>
</compile_context>

<pallas_src>
import jax
import jax.numpy as jnp
from jax.experimental import pallas as pl
from jax.experimental.pallas import tpu as pltpu


def _patch_embed_kernel(x_ref, w_ref, pb_ref, o_ref):
    """One (row-tile, hidden-tile, batch) block: patches^T @ W + (pos + bias)."""
    # x_ref : (1, K, TR)   channels-first patch tile, K = C*ph*pw
    # w_ref : (K, TH)      flattened conv weight tile
    # pb_ref: (TR, TH)     position embedding + conv bias tile (f32)
    # o_ref : (1, TR, TH)  output tile
    acc = jax.lax.dot_general(
        x_ref[0], w_ref[...],
        dimension_numbers=(((0,), (0,)), ((), ())),   # contract K (x is K-major)
        preferred_element_type=jnp.float32)            # f32 accumulation on MXU
    o_ref[0] = (acc + pb_ref[...]).astype(o_ref.dtype)


def _pick_tile(n, target, granule):
    """Largest divisor of n that is a multiple of `granule` and <= target.

    Falls back to n itself (a full-extent block is always legal)."""
    if n <= target:
        return n
    best = n
    t = granule
    while t <= target:
        if n % t == 0:
            best = t
        t += granule
    return best


def _channels_first_patches(x, ph, pw):
    """x: (B, C, H, W) -> (B, K, N), K = C*ph*pw, N = (H//ph)*(W//pw).

    K ordering (c, dh, dw) matches PyTorch's OIHW weight flatten; N ordering is
    row-major over the patch grid, matching conv-output flatten(2)."""
    B, C, H, W = x.shape
    gh, gw = H // ph, W // pw
    if (ph, pw) == (1, 1):
        # im2col fused away: pure metadata reshape, no HBM pass over x.
        return x.reshape(B, C, H * W)
    # TODO(synk): fold this extraction into the kernel (per-(dh,dw)-tap
    # sub-blocks accumulated on the idle MXU) to drop this extra HBM pass.
    x = x.reshape(B, C, gh, ph, gw, pw)
    x = x.transpose(0, 1, 3, 5, 2, 4)                 # (B, C, ph, pw, gh, gw)
    return x.reshape(B, C * ph * pw, gh * gw)


def patch_embed(x, weight, bias, pos_emb, patch, *,
                row_tile_target=1024, hidden_tile_target=1024,
                out_dtype=jnp.float32):
    """Conv2d(kernel=stride=patch) + flatten(2) + transpose(-1,-2) + pos add."""
    ph, pw = patch
    B, C, H, W = x.shape
    hidden = weight.shape[0]
    K = C * ph * pw
    N = (H // ph) * (W // pw)

    # 1x1 path: keep x in f32 (pure reshape -> no wrapper pass, exact matmul).
    # Non-1x1 path: the extraction transpose happens anyway, so do it (and the
    # kernel-side x read) in bf16 to halve those streams.
    compute_dtype = jnp.float32 if (ph, pw) == (1, 1) else jnp.bfloat16
    patches = _channels_first_patches(x.astype(compute_dtype), ph, pw)
    w2d = weight.reshape(hidden, K).T.astype(compute_dtype)        # (K, hidden)

    # pos + bias pre-added once in f32 (drops one add/broadcast per tile and
    # one input DMA stream from the kernel).
    pos_bias = (pos_emb.reshape(N, hidden).astype(jnp.float32)
                + bias.reshape(1, hidden).astype(jnp.float32))

    # Row tile is the lane dim of the x BlockSpec -> granule 128 (or full N).
    tr = _pick_tile(N, row_tile_target, 128)
    # Hidden tile: lane dim of w / pos_bias / out.  Tile only when 128-aligned;
    # otherwise use the full extent (a full-dim block is legal) -> no padding,
    # no 4x inflation of the output / pos_bias HBM streams, no slice pass.
    if hidden % 128 == 0:
        th = _pick_tile(hidden, hidden_tile_target, 128)
    else:
        th = hidden

    # v7x has 2 TensorCores: keep >= 2 parallel grid steps when possible.
    if B * (N // tr) * (hidden // th) < 2 and tr % 256 == 0:
        tr //= 2

    # Batch innermost: the weight and pos_bias block indices are unchanged
    # across consecutive steps, so Pallas skips their re-DMA per batch element.
    grid = (N // tr, hidden // th, B)

    out = pl.pallas_call(
        _patch_embed_kernel,
        out_shape=jax.ShapeDtypeStruct((B, N, hidden), out_dtype),
        grid=grid,
        in_specs=[
            pl.BlockSpec((1, K, tr), lambda i, j, b: (b, 0, i)),
            pl.BlockSpec((K, th), lambda i, j, b: (0, j)),
            pl.BlockSpec((tr, th), lambda i, j, b: (i, j)),
        ],
        out_specs=pl.BlockSpec((1, tr, th), lambda i, j, b: (b, i, j)),
        compiler_params=pltpu.CompilerParams(
            dimension_semantics=("parallel", "parallel", "parallel"),
            vmem_limit_bytes=48 * 1024 * 1024),
    )(patches, w2d, pos_bias)
    # TODO(synk): pass out_dtype=jnp.bfloat16 if downstream layers accept it --
    # halves the dominant output HBM stream (largest win on v5e).
    return out


class EmbeddingsPallas:
    """JAX/Pallas port of Embeddings (non-hybrid branch, eval mode).

    Note: the reference module's shapes are only self-consistent when patch
    size is (1, 1) (so n_patches // 4 == (H//2) * (W//2) for the b32 branch);
    we therefore use config.patches['size'] = 1.
    """

    def __init__(self, key, img_size, in_channels, hidden_size, patch_size=(1, 1)):
        ph, pw = patch_size
        H, W = img_size
        n_patches = (H // ph) * (W // pw)
        n_patches_b32 = n_patches // 4
        k1, k2, k3, k4, k5, k6 = jax.random.split(key, 6)
        s = 0.02
        self.patch_size = patch_size
        # patch_embeddings: Conv2d(in, hidden, kernel=patch, stride=patch), OIHW
        self.w = jax.random.normal(k1, (hidden_size, in_channels, ph, pw), jnp.float32) * s
        self.b = jax.random.normal(k2, (hidden_size,), jnp.float32) * s
        # patch_embeddings_b32: Conv2d(in, hidden, kernel=(2,2), stride=(2,2))
        self.w_b32 = jax.random.normal(k3, (hidden_size, in_channels, 2, 2), jnp.float32) * s
        self.b_b32 = jax.random.normal(k4, (hidden_size,), jnp.float32) * s
        # position embeddings (torch inits to zeros; deterministic randoms used
        # so the elementwise add is actually exercised)
        self.pos = jax.random.normal(k5, (1, n_patches, hidden_size), jnp.float32) * s
        self.pos_b32 = jax.random.normal(k6, (1, n_patches_b32, hidden_size), jnp.float32) * s

    def __call__(self, x):
        # TODO(synk): Dropout is identity in eval mode; training-mode dropout not implemented.
        features = None  # non-hybrid branch: hybrid ResNetV2 backbone not used
        embeddings = patch_embed(x, self.w, self.b, self.pos, self.patch_size)
        embeddings_b32 = patch_embed(x, self.w_b32, self.b_b32, self.pos_b32, (2, 2))
        # TODO(synk): the two calls could share one x read in a fused kernel.
        return embeddings, embeddings_b32, features


def _ref_patch_embed(x, w, b, pos, patch):
    """Pure-JAX reference (lax conv) for correctness checking."""
    y = jax.lax.conv_general_dilated(
        x, w, window_strides=patch, padding="VALID",
        dimension_numbers=("NCHW", "OIHW", "NCHW"))
    y = y + b.reshape(1, -1, 1, 1)
    B, Hd = y.shape[0], y.shape[1]
    y = y.reshape(B, Hd, -1).transpose(0, 2, 1)   # flatten(2).transpose(-1,-2)
    return y + pos


if __name__ == "__main__":
    B, C, H, W = 2, 4, 16, 16
    hidden = 32
    key = jax.random.PRNGKey(0)
    kx, kp = jax.random.split(key)

    x = jax.random.normal(kx, (B, C, H, W), jnp.float32)

    model = EmbeddingsPallas(kp, img_size=(H, W), in_channels=C,
                             hidden_size=hidden, patch_size=(1, 1))

    emb, emb_b32, features = model(x)
    jax.block_until_ready((emb, emb_b32))

    # Verify against pure-JAX f32 reference.  The 1x1 path runs fully in f32
    # (tight tolerance); the b32 path feeds the MXU in bf16 (relaxed tolerance,
    # K = 16 keeps the error small).
    ref = _ref_patch_embed(x, model.w, model.b, model.pos, model.patch_size)
    ref_b32 = _ref_patch_embed(x, model.w_b32, model.b_b32, model.pos_b32, (2, 2))
    assert emb.shape == (B, H * W, hidden)
    assert emb_b32.shape == (B, (H // 2) * (W // 2), hidden)
    assert features is None
    assert jnp.allclose(emb, ref, atol=1e-4, rtol=1e-4)
    assert jnp.allclose(emb_b32, ref_b32, atol=2e-2, rtol=2e-2)

    print("KERNEL_OK")
</pallas_src>

<mosaic_0001>
module attributes {stable_mosaic.version = 11 : i64} {
  func.func @_patch_embed_kernel(%arg0: i32, %arg1: i32, %arg2: i32, %arg3: memref<1x4x256xf32, #tpu.memory_space<vmem>>, %arg4: memref<4x32xf32, #tpu.memory_space<vmem>>, %arg5: memref<256x32xf32, #tpu.memory_space<vmem>>, %arg6: memref<1x256x32xf32, #tpu.memory_space<vmem>>) attributes {dimension_semantics = [#tpu.dimension_semantics<parallel>, #tpu.dimension_semantics<parallel>, #tpu.dimension_semantics<parallel>], iteration_bounds = array<i64: 1, 1, 2>, scalar_prefetch = 0 : i64, scratch_operands = 0 : i64, tpu.core_type = #tpu.core_type<tc>, window_params = [{transform_indices = @transform_0, window_bounds = array<i64: 1, 4, 256>}, {transform_indices = @transform_1, window_bounds = array<i64: 4, 32>}, {transform_indices = @transform_2, window_bounds = array<i64: 256, 32>}, {transform_indices = @transform_3, window_bounds = array<i64: 1, 256, 32>}]} {
    %c0 = arith.constant 0 : index
    %c0_0 = arith.constant 0 : index
    %c0_1 = arith.constant 0 : index
    %0 = vector.load %arg3[%c0, %c0_0, %c0_1] : memref<1x4x256xf32, #tpu.memory_space<vmem>>, vector<1x4x256xf32>
    %1 = vector.shape_cast %0 : vector<1x4x256xf32> to vector<4x256xf32>
    %c0_2 = arith.constant 0 : index
    %c0_3 = arith.constant 0 : index
    %2 = vector.load %arg4[%c0_2, %c0_3] : memref<4x32xf32, #tpu.memory_space<vmem>>, vector<4x32xf32>
    %cst = arith.constant dense<0.000000e+00> : vector<256x32xf32>
    %3 = tpu.matmul %1, %2, %cst {dimension_numbers = #tpu.dot_dimension_numbers<[0], [0], [1], [1], [0, 1, 1, 1], [], []>} : vector<4x256xf32>, vector<4x32xf32>, vector<256x32xf32> -> vector<256x32xf32>
    %c0_4 = arith.constant 0 : index
    %c0_5 = arith.constant 0 : index
    %4 = vector.load %arg5[%c0_4, %c0_5] : memref<256x32xf32, #tpu.memory_space<vmem>>, vector<256x32xf32>
    %5 = arith.addf %3, %4 : vector<256x32xf32>
    %c0_6 = arith.constant 0 : index
    %c0_7 = arith.constant 0 : index
    %c0_8 = arith.constant 0 : index
    %6 = vector.load %arg6[%c0_6, %c0_7, %c0_8] : memref<1x256x32xf32, #tpu.memory_space<vmem>>, vector<1x256x32xf32>
    %7 = vector.shape_cast %6 : vector<1x256x32xf32> to vector<256x32xf32>
    %8 = vector.shape_cast %5 : vector<256x32xf32> to vector<1x256x32xf32>
    tpu.vector_store %arg6[%c0_6, %c0_7, %c0_8], %8 {strides = array<i32>} : memref<1x256x32xf32, #tpu.memory_space<vmem>>, vector<1x256x32xf32>,
    return
  }
  func.func @transform_0(%arg0: i32, %arg1: i32, %arg2: i32) -> (i32, i32, i32) {
    %c0_i32 = arith.constant 0 : i32
    %c0_i32_0 = arith.constant 0 : i32
    return %arg2, %c0_i32, %arg0 : i32, i32, i32
  }
  func.func @transform_1(%arg0: i32, %arg1: i32, %arg2: i32) -> (i32, i32) {
    %c0_i32 = arith.constant 0 : i32
    %c0_i32_0 = arith.constant 0 : i32
    return %c0_i32, %arg1 : i32, i32
  }
  func.func @transform_2(%arg0: i32, %arg1: i32, %arg2: i32) -> (i32, i32) {
    %c0_i32 = arith.constant 0 : i32
    return %arg0, %arg1 : i32, i32
  }
  func.func @transform_3(%arg0: i32, %arg1: i32, %arg2: i32) -> (i32, i32, i32) {
    %c0_i32 = arith.constant 0 : i32
    return %arg2, %arg0, %arg1 : i32, i32, i32
  }
}

</mosaic_0001>

<bundles_post_ra>
// kernel: tpu_custom_call.1
= control target key start
LH: loop header
LB: loop body
LE: loop exit
PB: predicated region body
PF: predicated region fallthrough
CT: control target
= control target key end

     0   :  { %s1071_s12 = smov 0   ;;  %s1073_s13 = smov 0   ;;  %s1305_s0 = inlined_call_operand.vmem [shape: f32[2,4,256], index: 0, kind: input, shape index: {}]   ;;  %s1306_s1 = inlined_call_operand.vmem [shape: f32[4,32], index: 1, kind: input, shape index: {}]   ;;  %s1307_s2 = inlined_call_operand.vmem [shape: f32[256,32], index: 2, kind: input, shape index: {}]   ;;  %s1308_s3 = inlined_call_operand.vmem [shape: f32[2,256,32], index: 3, kind: output, shape index: {}]  }
   0x1   :  { %s1075_s14 = smov 0  }
   0x2 LB: > { %s25_s15 = sadd.s32 1, %s1045_s13  ;;  %p874_p0 = scmp.ge.s32.totalorder %s1049_s14, 1  ;;  %s1049_s14 = sphi %s1075_s14, %s13_s14   ;;  %s1045_s13 = sphi %s1073_s13, %s1310_s13   ;;  %s1041_s12 = sphi %s1071_s12, %s1309_s12  }
   0x3   : > { %p26_p1 = scmp.ge.s32.totalorder %s25_s15, 2  ;;  %p192_p2 = scmp.lt.s32.totalorder %s1049_s14, 3 }
   0x5   : > { %s1312_s15 = smov (%p26_p1, %s25_s15), 0  ;;  %p193_p3 = pnand %p874_p0, %p192_p2 }
   0x6   : > { %p240_p4 = scmp.lt.s32.totalorder (!%p193_p3), %s1041_s12, 1  ;;  %v276_v1 = vld [vmem:[%s1306_s1] sm:$0xf] (!%p193_p3)  ;;  %vm473_vm0 = vcmask (!%p193_p3), 1043456   ;;  %vm376_vm1 = vcmask (!%p193_p3), 31744   ;;  %v278_v35 = vld [vmem:[%s1307_s2 + $0x8] sm:$0xff] (!%p193_p3) }
   0x7   : > { %196 = sbr.rel (%p193_p3) target bundleno = 487 (0x1e7), region = 32  ;;  %949 = vmatprep.subr.msk.mxu0 (!%p193_p3), %vm473_vm0, %v276_v1  ;;  %999 = vmatprep.subr.msk.mxu1 (!%p193_p3), %vm473_vm0, %v276_v1  ;;  %v277_v36 = vld [vmem:[%s1307_s2] sm:$0xff] (!%p193_p3)  ;;  %vm702_vm2 = vcmask (!%p193_p3), 261120   ;;  %v280_v41 = vld [vmem:[%s1307_s2 + $0x18] sm:$0xff] (!%p193_p3)  ;;  %v279_v42 = vld [vmem:[%s1307_s2 + $0x10] sm:$0xff] (!%p193_p3) }
   0x8   : > { %950 = vmatpush3.msk.msra.mxu0 (!%p193_p3), %vm473_vm0, %v276_v1  ;;  %1000 = vmatpush3.msk.msra.mxu1 (!%p193_p3), %vm473_vm0, %v276_v1  ;;  %v282_v47 = vld [vmem:[%s1307_s2 + $0x28] sm:$0xff] (!%p193_p3)  ;;  %v281_v48 = vld [vmem:[%s1307_s2 + $0x20] sm:$0xff] (!%p193_p3)  ;;  %v284_v53 = vld [vmem:[%s1307_s2 + $0x38] sm:$0xff] (!%p193_p3) }
   0x9   : > { %v283_v54 = vld [vmem:[%s1307_s2 + $0x30] sm:$0xff] (!%p193_p3)  ;;  %v286_v59 = vld [vmem:[%s1307_s2 + $0x48] sm:$0xff] (!%p193_p3)  ;;  %v285_v60 = vld [vmem:[%s1307_s2 + $0x40] sm:$0xff] (!%p193_p3) }
   0xa   : > { %v288_v1 = vld [vmem:[%s1307_s2 + $0x58] sm:$0xff] (!%p193_p3) }
   0xe   : > { %s1314_s12 = smov (!%p240_p4, %s1041_s12), 1 }
   0xf   : > { %s914_s16 = sshll.u32 %s1314_s12, 3  ;;  %s915_s22 = sshll.u32 %s1314_s12, 8 }
  0x10   : > { %s247_s19 = scalar_lea.vmem %s1305_s0, %s914_s16  ;;  %s1140_s29 = scalar_lea.vmem %s1308_s3, %s915_s22 }
  0x11   : > { %v275_v0 = vld [vmem:[%s247_s19] sm:$0xff] }
  0x12   : > { %312 = vxpose.xlu0.b32.start.end [1/1] (short) %v275_v0, 128  ;;  %v310_v2 = vcombine.high %v275_v0, %v275_v0 }
  0x4f   : > { %344 = vxpose.xlu0.b32.start.end [1/1] (short) %v310_v2, 128  ;;  %v287_v2 = vld [vmem:[%s1307_s2 + $0x50] sm:$0xff] }
  0x92   : > { %v328_v3 = vpop.trf.xlu0 }
  0x93   : > { %951 = vmatprep.mubr.msk.f32.mxu0 %vm376_vm1, %v328_v3 }
  0x96   : > { %v329_v4 = vpop.trf.xlu0 }
  0x97   : > { %952 = vmatmul.mubr.msk.f32.vlgmr.msra.gmra.mrb[0].mxu0 %vm376_vm1, %v329_v4 }
  0x9a   : > { %v330_v5 = vpop.trf.xlu0 }
  0x9b   : > { %954 = vmatprep.mubr.msk.f32.mxu0 %vm376_vm1, %v330_v5 }
  0x9e   : > { %v331_v6 = vpop.trf.xlu0 }
  0x9f   : > { %955 = vmatmul.mubr.msk.f32.gmra.mrb[2].mxu0 %vm376_vm1, %v331_v6 }
  0xa2   : > { %v332_v7 = vpop.trf.xlu0 }
  0xa3   : > { %957 = vmatprep.mubr.msk.f32.mxu0 %vm376_vm1, %v332_v7  ;;  %v290_v7 = vld [vmem:[%s1307_s2 + $0x68] sm:$0xff] }
  0xa6   : > { %v333_v8 = vpop.trf.xlu0 }
  0xa7   : > { %958 = vmatmul.mubr.msk.f32.gmra.mrb[4].mxu0 %vm376_vm1, %v333_v8  ;;  %v289_v8 = vld [vmem:[%s1307_s2 + $0x60] sm:$0xff] }
  0xaa   : > { %v334_v9 = vpop.trf.xlu0 }
  0xab   : > { %960 = vmatprep.mubr.msk.f32.mxu0 %vm376_vm1, %v334_v9 }
  0xae   : > { %v335_v10 = vpop.trf.xlu0 }
  0xaf   : > { %961 = vmatmul.mubr.msk.f32.gmra.mrb[6].mxu0 %vm376_vm1, %v335_v10 }
  0xb2   : > { %v336_v11 = vpop.trf.xlu0 }
  0xb3   : > { %963 = vmatprep.mubr.msk.f32.mxu0 %vm376_vm1, %v336_v11 }
  0xb6   : > { %v337_v12 = vpop.trf.xlu0 }
  0xb7   : > { %964 = vmatmul.mubr.msk.f32.gmra.mrb[8].mxu0 %vm376_vm1, %v337_v12 }
  0xba   : > { %v338_v13 = vpop.trf.xlu0 }
  0xbb   : > { %966 = vmatprep.mubr.msk.f32.mxu0 %vm376_vm1, %v338_v13  ;;  %v292_v13 = vld [vmem:[%s1307_s2 + $0x78] sm:$0xff] }
  0xbe   : > { %v339_v14 = vpop.trf.xlu0 }
  0xbf   : > { %967 = vmatmul.mubr.msk.f32.gmra.mrb[10].mxu0 %vm376_vm1, %v339_v14  ;;  %v291_v14 = vld [vmem:[%s1307_s2 + $0x70] sm:$0xff] }
  0xc2   : > { %v340_v15 = vpop.trf.xlu0 }
  0xc3   : > { %969 = vmatprep.mubr.msk.f32.mxu0 %vm376_vm1, %v340_v15 }
  0xc6   : > { %v341_v16 = vpop.trf.xlu0 }
  0xc7   : > { %970 = vmatmul.mubr.msk.f32.gmra.mrb[12].mxu0 %vm376_vm1, %v341_v16 }
  0xca   : > { %v342_v17 = vpop.trf.xlu0 }
  0xcb   : > { %972 = vmatprep.mubr.msk.f32.mxu0 %vm376_vm1, %v342_v17 }
  0xce   : > { %v343_v18 = vpop.trf.xlu0 }
  0xcf   : > { %973 = vmatmul.mubr.msk.f32.gmra.mrb[14].mxu0 %vm376_vm1, %v343_v18 }
  0xd2   : > { %v360_v19 = vpop.trf.xlu0 }
  0xd3   : > { %975 = vmatprep.mubr.msk.f32.mxu1 %vm376_vm1, %v360_v19  ;;  %v294_v19 = vld [vmem:[%s1307_s2 + $0x88] sm:$0xff] }
  0xd6   : > { %v361_v20 = vpop.trf.xlu0 }
  0xd7   : > { %976 = vmatmul.mubr.msk.f32.vlgmr.msra.gmra.mrb[0].mxu1 %vm376_vm1, %v361_v20  ;;  %v293_v20 = vld [vmem:[%s1307_s2 + $0x80] sm:$0xff] }
  0xda   : > { %v362_v21 = vpop.trf.xlu0 }
  0xdb   : > { %978 = vmatprep.mubr.msk.f32.mxu1 %vm376_vm1, %v362_v21 }
  0xde   : > { %v363_v22 = vpop.trf.xlu0 }
  0xdf   : > { %979 = vmatmul.mubr.msk.f32.gmra.mrb[2].mxu1 %vm376_vm1, %v363_v22 }
  0xe2   : > { %v364_v23 = vpop.trf.xlu0 }
  0xe3   : > { %981 = vmatprep.mubr.msk.f32.mxu1 %vm376_vm1, %v364_v23 }
  0xe6   : > { %v365_v24 = vpop.trf.xlu0 }
  0xe7   : > { %982 = vmatmul.mubr.msk.f32.gmra.mrb[4].mxu1 %vm376_vm1, %v365_v24 }
  0xea   : > { %v366_v25 = vpop.trf.xlu0 }
  0xeb   : > { %984 = vmatprep.mubr.msk.f32.mxu1 %vm376_vm1, %v366_v25  ;;  %v296_v25 = vld [vmem:[%s1307_s2 + $0x98] sm:$0xff] }
  0xee   : > { %v367_v26 = vpop.trf.xlu0 }
  0xef   : > { %985 = vmatmul.mubr.msk.f32.gmra.mrb[6].mxu1 %vm376_vm1, %v367_v26  ;;  %v295_v26 = vld [vmem:[%s1307_s2 + $0x90] sm:$0xff] }
  0xf2   : > { %v368_v27 = vpop.trf.xlu0 }
  0xf3   : > { %987 = vmatprep.mubr.msk.f32.mxu1 %vm376_vm1, %v368_v27 }
  0xf6   : > { %v369_v28 = vpop.trf.xlu0 }
  0xf7   : > { %988 = vmatmul.mubr.msk.f32.gmra.mrb[8].mxu1 %vm376_vm1, %v369_v28 }
  0xfa   : > { %v370_v29 = vpop.trf.xlu0 }
  0xfb   : > { %990 = vmatprep.mubr.msk.f32.mxu1 %vm376_vm1, %v370_v29 }
  0xfe   : > { %v371_v30 = vpop.trf.xlu0 }
  0xff   : > { %991 = vmatmul.mubr.msk.f32.gmra.mrb[10].mxu1 %vm376_vm1, %v371_v30 }
 0x102   : > { %v372_v31 = vpop.trf.xlu0 }
 0x103   : > { %993 = vmatprep.mubr.msk.f32.mxu1 %vm376_vm1, %v372_v31  ;;  %v298_v31 = vld [vmem:[%s1307_s2 + $0xa8] sm:$0xff] }
 0x106   : > { %v373_v32 = vpop.trf.xlu0 }
 0x107   : > { %994 = vmatmul.mubr.msk.f32.gmra.mrb[12].mxu1 %vm376_vm1, %v373_v32  ;;  %v297_v32 = vld [vmem:[%s1307_s2 + $0xa0] sm:$0xff] }
 0x10a   : > { %v374_v33 = vpop.trf.xlu0 }
 0x10b   : > { %996 = vmatprep.mubr.msk.f32.mxu1 %vm376_vm1, %v374_v33 }
 0x10e   : > { %v375_v34 = vpop.trf.xlu0 }
 0x10f   : > { %997 = vmatmul.mubr.msk.f32.gmra.mrb[14].mxu1 %vm376_vm1, %v375_v34 }
 0x16a   : > { %v953_v37 = vpop.f32.mrb[0].mxu0 }
 0x16b   : > { %v549_v38 = vadd.f32 %v953_v37, %v278_v35  ;;  %v543_v39 = vpop.f32.mrb[1].mxu0  ;;  %v300_v37 = vld [vmem:[%s1307_s2 + $0xb8] sm:$0xff] }
 0x16c   : > { %v544_v40 = vadd.f32 %v543_v39, %v277_v36 }
 0x16d   : > { %704 = vst.msk [vmem:[%s1140_s29 + $0x8] sm:$0xff] %vm702_vm2, %v549_v38  ;;  %v299_v38 = vld [vmem:[%s1307_s2 + $0xb0] sm:$0xff] }
 0x16e   : > { %703 = vst.msk [vmem:[%s1140_s29] sm:$0xff] %vm702_vm2, %v544_v40 }
 0x172   : > { %v956_v43 = vpop.f32.mrb[2].mxu0 }
 0x173   : > { %v559_v44 = vadd.f32 %v956_v43, %v280_v41  ;;  %v553_v45 = vpop.f32.mrb[3].mxu0  ;;  %v302_v43 = vld [vmem:[%s1307_s2 + $0xc8] sm:$0xff] }
 0x174   : > { %v554_v46 = vadd.f32 %v553_v45, %v279_v42 }
 0x175   : > { %706 = vst.msk [vmem:[%s1140_s29 + $0x18] sm:$0xff] %vm702_vm2, %v559_v44  ;;  %v301_v44 = vld [vmem:[%s1307_s2 + $0xc0] sm:$0xff] }
 0x176   : > { %705 = vst.msk [vmem:[%s1140_s29 + $0x10] sm:$0xff] %vm702_vm2, %v554_v46 }
 0x17a   : > { %v959_v49 = vpop.f32.mrb[4].mxu0 }
 0x17b   : > { %v569_v50 = vadd.f32 %v959_v49, %v282_v47  ;;  %v563_v51 = vpop.f32.mrb[5].mxu0  ;;  %v304_v49 = vld [vmem:[%s1307_s2 + $0xd8] sm:$0xff] }
 0x17c   : > { %v564_v52 = vadd.f32 %v563_v51, %v281_v48 }
 0x17d   : > { %708 = vst.msk [vmem:[%s1140_s29 + $0x28] sm:$0xff] %vm702_vm2, %v569_v50  ;;  %v303_v50 = vld [vmem:[%s1307_s2 + $0xd0] sm:$0xff] }
 0x17e   : > { %707 = vst.msk [vmem:[%s1140_s29 + $0x20] sm:$0xff] %vm702_vm2, %v564_v52 }
 0x182   : > { %v962_v55 = vpop.f32.mrb[6].mxu0 }
 0x183   : > { %v579_v56 = vadd.f32 %v962_v55, %v284_v53  ;;  %v573_v57 = vpop.f32.mrb[7].mxu0  ;;  %v306_v55 = vld [vmem:[%s1307_s2 + $0xe8] sm:$0xff] }
 0x184   : > { %v574_v58 = vadd.f32 %v573_v57, %v283_v54 }
 0x185   : > { %710 = vst.msk [vmem:[%s1140_s29 + $0x38] sm:$0xff] %vm702_vm2, %v579_v56  ;;  %v305_v56 = vld [vmem:[%s1307_s2 + $0xe0] sm:$0xff] }
 0x186   : > { %709 = vst.msk [vmem:[%s1140_s29 + $0x30] sm:$0xff] %vm702_vm2, %v574_v58 }
 0x18a   : > { %v965_v61 = vpop.f32.mrb[8].mxu0 }
 0x18b   : > { %v589_v62 = vadd.f32 %v965_v61, %v286_v59  ;;  %v583_v63 = vpop.f32.mrb[9].mxu0  ;;  %v308_v61 = vld [vmem:[%s1307_s2 + $0xf8] sm:$0xff] }
 0x18c   : > { %v584_v0 = vadd.f32 %v583_v63, %v285_v60 }
 0x18d   : > { %712 = vst.msk [vmem:[%s1140_s29 + $0x48] sm:$0xff] %vm702_vm2, %v589_v62  ;;  %v307_v62 = vld [vmem:[%s1307_s2 + $0xf0] sm:$0xff] }
 0x18e   : > { %711 = vst.msk [vmem:[%s1140_s29 + $0x40] sm:$0xff] %vm702_vm2, %v584_v0 }
 0x192   : > { %v968_v3 = vpop.f32.mrb[10].mxu0 }
 0x193   : > { %v599_v4 = vadd.f32 %v968_v3, %v288_v1  ;;  %v593_v5 = vpop.f32.mrb[11].mxu0 }
 0x194   : > { %v594_v6 = vadd.f32 %v593_v5, %v287_v2 }
 0x195   : > { %714 = vst.msk [vmem:[%s1140_s29 + $0x58] sm:$0xff] %vm702_vm2, %v599_v4 }
 0x196   : > { %713 = vst.msk [vmem:[%s1140_s29 + $0x50] sm:$0xff] %vm702_vm2, %v594_v6 }
 0x19a   : > { %v971_v9 = vpop.f32.mrb[12].mxu0 }
 0x19b   : > { %v609_v10 = vadd.f32 %v971_v9, %v290_v7  ;;  %v603_v11 = vpop.f32.mrb[13].mxu0 }
 0x19c   : > { %v604_v12 = vadd.f32 %v603_v11, %v289_v8 }
 0x19d   : > { %716 = vst.msk [vmem:[%s1140_s29 + $0x68] sm:$0xff] %vm702_vm2, %v609_v10 }
 0x19e   : > { %715 = vst.msk [vmem:[%s1140_s29 + $0x60] sm:$0xff] %vm702_vm2, %v604_v12 }
 0x1a2   : > { %v974_v15 = vpop.f32.mrb[14].mxu0 }
 0x1a3   : > { %v619_v16 = vadd.f32 %v974_v15, %v292_v13  ;;  %v613_v17 = vpop.f32.mrb[15].mxu0 }
 0x1a4   : > { %v614_v18 = vadd.f32 %v613_v17, %v291_v14 }
 0x1a5   : > { %718 = vst.msk [vmem:[%s1140_s29 + $0x78] sm:$0xff] %vm702_vm2, %v619_v16 }
 0x1a6   : > { %717 = vst.msk [vmem:[%s1140_s29 + $0x70] sm:$0xff] %vm702_vm2, %v614_v18 }
 0x1aa   : > { %v977_v21 = vpop.f32.mrb[0].mxu1 }
 0x1ab   : > { %v629_v22 = vadd.f32 %v977_v21, %v294_v19  ;;  %v623_v23 = vpop.f32.mrb[1].mxu1 }
 0x1ac   : > { %v624_v24 = vadd.f32 %v623_v23, %v293_v20 }
 0x1ad   : > { %720 = vst.msk [vmem:[%s1140_s29 + $0x88] sm:$0xff] %vm702_vm2, %v629_v22 }
 0x1ae   : > { %719 = vst.msk [vmem:[%s1140_s29 + $0x80] sm:$0xff] %vm702_vm2, %v624_v24 }
 0x1b2   : > { %v980_v27 = vpop.f32.mrb[2].mxu1 }
 0x1b3   : > { %v639_v28 = vadd.f32 %v980_v27, %v296_v25  ;;  %v633_v29 = vpop.f32.mrb[3].mxu1 }
 0x1b4   : > { %v634_v30 = vadd.f32 %v633_v29, %v295_v26 }
 0x1b5   : > { %722 = vst.msk [vmem:[%s1140_s29 + $0x98] sm:$0xff] %vm702_vm2, %v639_v28 }
 0x1b6   : > { %721 = vst.msk [vmem:[%s1140_s29 + $0x90] sm:$0xff] %vm702_vm2, %v634_v30 }
 0x1ba   : > { %v983_v33 = vpop.f32.mrb[4].mxu1 }
 0x1bb   : > { %v649_v34 = vadd.f32 %v983_v33, %v298_v31  ;;  %v643_v35 = vpop.f32.mrb[5].mxu1 }
 0x1bc   : > { %v644_v36 = vadd.f32 %v643_v35, %v297_v32 }
 0x1bd   : > { %724 = vst.msk [vmem:[%s1140_s29 + $0xa8] sm:$0xff] %vm702_vm2, %v649_v34 }
 0x1be   : > { %723 = vst.msk [vmem:[%s1140_s29 + $0xa0] sm:$0xff] %vm702_vm2, %v644_v36 }
 0x1c2   : > { %v986_v39 = vpop.f32.mrb[6].mxu1 }
 0x1c3   : > { %v659_v40 = vadd.f32 %v986_v39, %v300_v37  ;;  %v653_v41 = vpop.f32.mrb[7].mxu1 }
 0x1c4   : > { %v654_v42 = vadd.f32 %v653_v41, %v299_v38 }
 0x1c5   : > { %726 = vst.msk [vmem:[%s1140_s29 + $0xb8] sm:$0xff] %vm702_vm2, %v659_v40 }
 0x1c6   : > { %725 = vst.msk [vmem:[%s1140_s29 + $0xb0] sm:$0xff] %vm702_vm2, %v654_v42 }
 0x1ca   : > { %v989_v45 = vpop.f32.mrb[8].mxu1 }
 0x1cb   : > { %v669_v46 = vadd.f32 %v989_v45, %v302_v43  ;;  %v663_v47 = vpop.f32.mrb[9].mxu1 }
 0x1cc   : > { %v664_v48 = vadd.f32 %v663_v47, %v301_v44 }
 0x1cd   : > { %728 = vst.msk [vmem:[%s1140_s29 + $0xc8] sm:$0xff] %vm702_vm2, %v669_v46 }
 0x1ce   : > { %727 = vst.msk [vmem:[%s1140_s29 + $0xc0] sm:$0xff] %vm702_vm2, %v664_v48 }
 0x1d2   : > { %v992_v51 = vpop.f32.mrb[10].mxu1 }
 0x1d3   : > { %v679_v52 = vadd.f32 %v992_v51, %v304_v49  ;;  %v673_v53 = vpop.f32.mrb[11].mxu1 }
 0x1d4   : > { %v674_v54 = vadd.f32 %v673_v53, %v303_v50 }
 0x1d5   : > { %730 = vst.msk [vmem:[%s1140_s29 + $0xd8] sm:$0xff] %vm702_vm2, %v679_v52 }
 0x1d6   : > { %729 = vst.msk [vmem:[%s1140_s29 + $0xd0] sm:$0xff] %vm702_vm2, %v674_v54 }
 0x1da   : > { %v995_v57 = vpop.f32.mrb[12].mxu1 }
 0x1db   : > { %v689_v58 = vadd.f32 %v995_v57, %v306_v55  ;;  %v683_v59 = vpop.f32.mrb[13].mxu1 }
 0x1dc   : > { %v684_v60 = vadd.f32 %v683_v59, %v305_v56 }
 0x1dd   : > { %732 = vst.msk [vmem:[%s1140_s29 + $0xe8] sm:$0xff] %vm702_vm2, %v689_v58 }
 0x1de   : > { %731 = vst.msk [vmem:[%s1140_s29 + $0xe0] sm:$0xff] %vm702_vm2, %v684_v60 }
 0x1e2   : > { %v998_v63 = vpop.f32.mrb[14].mxu1 }
 0x1e3   : > { %v699_v0 = vadd.f32 %v998_v63, %v308_v61  ;;  %v693_v1 = vpop.f32.mrb[15].mxu1 }
 0x1e4   : > { %v694_v2 = vadd.f32 %v693_v1, %v307_v62 }
 0x1e5   : > { %734 = vst.msk [vmem:[%s1140_s29 + $0xf8] sm:$0xff] %vm702_vm2, %v699_v0 }
 0x1e6   : > { %733 = vst.msk [vmem:[%s1140_s29 + $0xf0] sm:$0xff] %vm702_vm2, %v694_v2 }
 0x1e7 PF: > { %s13_s14 = sadd.s32 1, %s1049_s14   ;;  %s1309_s12 = smov %s1045_s13 }
 0x1e8   : > { %p10_p5 = scmp.ge.s32.totalorder %s13_s14, 4   ;;  %s1310_s13 = smov %s1312_s15 }
 0x1ea   :  { %12 = sbr.rel (!%p10_p5) target bundleno = 2 (0x2), region = 68 }

</bundles_post_ra>
